<compile_context>
chip_gen: v7x
topology: tpu7x:2x2x1
jax: 0.10.0
libtpu: 0.0.40
codegen_flags: <defaults>
</compile_context>

<pallas_src>
import jax
import jax.numpy as jnp
from jax.experimental import pallas as pl
from jax.experimental.pallas import tpu as pltpu

F32 = jnp.float32
MXU_DTYPE = jnp.bfloat16  # matmul operand dtype (f32 accumulate); F32 for exact f32

# ----------------------- model configuration -----------------------
NODE_TYPES = ("user", "item")
IN_CHANNELS = {"user": 6, "item": 10}
NUM_NODES = {"user": 12, "item": 16}
EDGE_TYPES = (("user", "rates", "item"), ("item", "rev_rates", "user"))
NUM_EDGES = {EDGE_TYPES[0]: 40, EDGE_TYPES[1]: 40}
HIDDEN = 32
OUT = 16
NUM_LAYERS = 3
LN_EPS = 1e-5

IN_TOTAL = sum(IN_CHANNELS[t] for t in NODE_TYPES)      # 16
N_STACK = 32                                             # user block 16 + item block 16
BLOCKS = {"user": (0, 16), "item": (16, 32)}             # sublane-tile-aligned row blocks
ROWS = {"user": (0, NUM_NODES["user"]),                  # real rows inside each block
        "item": (16, 16 + NUM_NODES["item"])}

# per-row table layout: 0 = encoder bias; layer l: 1+3l bias, 2+3l gamma, 3+3l beta;
# 1+3*NUM_LAYERS + i = skip bias i
TAB_ENTRIES = 1 + 3 * NUM_LAYERS + (NUM_LAYERS - 1)      # 12


# ----------------------- fused Pallas kernel -----------------------

def _fused_gnn_kernel(x_ref, adj_ref, w_enc_ref, w_conv_ref, w_skip_ref, tab_ref, o_ref):
    """Whole-network forward in one kernel (6 inputs, 1 output, everything in VMEM)."""

    def mm(a, b):  # bf16 MXU operands, f32 accumulation
        return jnp.dot(a, b, preferred_element_type=jnp.float32)

    # (1) per-node-type encoders as one block-diagonal matmul: Linear -> ReLU
    # TODO(synk): dropout is implemented as eval-mode identity (stochastic mask omitted).
    h = jnp.maximum(mm(x_ref[...], w_enc_ref[...]) + tab_ref[0], 0.0)      # [32, HIDDEN] f32

    adj = adj_ref[...]                                                      # [32, 32] bf16
    skips = []
    for layer in range(NUM_LAYERS):
        out_c = OUT if layer == NUM_LAYERS - 1 else HIDDEN
        h_bf = h.astype(MXU_DTYPE)               # single cast per layer, reused everywhere
        if layer < NUM_LAYERS - 1:
            skips.append(h_bf)

        # mean neighbour aggregation for BOTH edge types in one matmul
        aggr = mm(adj, h_bf).astype(MXU_DTYPE)                              # [32, HIDDEN]

        # per destination type: fused concat-K matmul  [aggr | h_dst] @ [W_l ; W_r(+W_proj)]
        conv_blocks = []
        for ti, t in enumerate(NODE_TYPES):
            r0, r1 = BLOCKS[t]
            cat = jnp.concatenate([aggr[r0:r1], h_bf[r0:r1]], axis=1)       # [16, 2*HIDDEN]
            conv_blocks.append(mm(cat, w_conv_ref[layer * 2 + ti, :, :out_c]))
        z = jnp.concatenate(conv_blocks, axis=0) + tab_ref[1 + 3 * layer, :, :out_c]

        if out_c == HIDDEN:
            z = z + h            # identity residual (projection already folded into W/bias)
        z = jnp.maximum(z, 0.0)

        # LayerNorm (per-row gamma/beta tables cover both node types; pad rows are zero)
        mean = jnp.mean(z, axis=-1, keepdims=True)
        var = jnp.mean((z - mean) ** 2, axis=-1, keepdims=True)
        h = ((z - mean) * jax.lax.rsqrt(var + LN_EPS)
             * tab_ref[2 + 3 * layer, :, :out_c] + tab_ref[3 + 3 * layer, :, :out_c])

    # (3) skip-connection epilogue: one shared Linear per skipped layer (stacked block)
    for i in range(NUM_LAYERS - 1):
        h = h + mm(skips[i], w_skip_ref[i]) + tab_ref[1 + 3 * NUM_LAYERS + i, :, :OUT]

    o_ref[...] = h.astype(o_ref.dtype)


def gnn_forward(x_all, adj_full, params):
    w_enc, w_conv, w_skip, tab = params
    vmem = lambda: pl.BlockSpec(memory_space=pltpu.MemorySpace.VMEM)
    out = pl.pallas_call(
        _fused_gnn_kernel,
        out_shape=jax.ShapeDtypeStruct((N_STACK, OUT), F32),
        in_specs=[vmem() for _ in range(6)],
        out_specs=vmem(),
    )(x_all, adj_full, w_enc, w_conv, w_skip, tab)
    # NOTE(v7x): for throughput over many graphs, add a leading batch grid axis with
    # dimension_semantics=("parallel",) instead of splitting this single tiny graph.
    u0, u1 = ROWS["user"]
    i0, i1 = ROWS["item"]
    return {"user": out[u0:u1], "item": out[i0:i1]}


gnn_forward_jit = jax.jit(gnn_forward)


# ----------------------- host-side setup (one-time) -----------------------

def stack_features(x_user, x_item):
    """Stack per-type features into one [32, 16] block-feature matrix (bf16 for the MXU)."""
    x = jnp.zeros((N_STACK, IN_TOTAL), F32)
    x = x.at[ROWS["user"][0]:ROWS["user"][1], :IN_CHANNELS["user"]].set(x_user)
    x = x.at[ROWS["item"][0]:ROWS["item"][1], IN_CHANNELS["user"]:].set(x_item)
    return x.astype(MXU_DTYPE)


def build_full_adj(edge_index_dict):
    """Row-normalized dense block adjacency A[dst_row, src_row] for ALL edge types at once."""
    a = jnp.zeros((N_STACK, N_STACK), F32)
    for et in EDGE_TYPES:
        src_t, _, dst_t = et
        src, dst = edge_index_dict[et][0], edge_index_dict[et][1]
        blk = jnp.zeros((NUM_NODES[dst_t], NUM_NODES[src_t]), F32).at[dst, src].add(1.0)
        deg = blk.sum(axis=1, keepdims=True)
        blk = blk / jnp.maximum(deg, 1.0)
        d0 = ROWS[dst_t][0]
        s0 = ROWS[src_t][0]
        a = a.at[d0:d0 + NUM_NODES[dst_t], s0:s0 + NUM_NODES[src_t]].set(blk)
    return a.astype(MXU_DTYPE)


def init_params(key):
    """Raw per-module params (mirroring the PyTorch structure), packed into 4 kernel blobs."""
    keys = iter(jax.random.split(key, 256))
    nk = lambda: next(keys)
    w = lambda i, o: jax.random.normal(nk(), (i, o), F32) * 0.1
    b = lambda o: jax.random.normal(nk(), (o,), F32) * 0.01

    # ---- raw parameters ----
    enc = {t: (w(IN_CHANNELS[t], HIDDEN), b(HIDDEN)) for t in NODE_TYPES}
    layers = []
    for layer in range(NUM_LAYERS):
        out_c = OUT if layer == NUM_LAYERS - 1 else HIDDEN
        et_p = {et: (w(HIDDEN, out_c), w(HIDDEN, out_c), b(out_c)) for et in EDGE_TYPES}
        nt_p = {}
        for t in NODE_TYPES:
            proj = (w(HIDDEN, out_c), b(out_c)) if HIDDEN != out_c else None
            gamma = 1.0 + 0.1 * jax.random.normal(nk(), (out_c,), F32)
            beta = 0.1 * jax.random.normal(nk(), (out_c,), F32)
            nt_p[t] = (proj, gamma, beta)
        layers.append((et_p, nt_p))
    skips = [(w(HIDDEN, OUT), b(OUT)) for _ in range(NUM_LAYERS - 1)]

    # ---- pack into kernel blobs ----
    def row_table(vals, width):
        """Per-row table [32, 32]: node-type vectors broadcast over their rows, pad rows 0."""
        t = jnp.zeros((N_STACK, HIDDEN), F32)
        for nt in NODE_TYPES:
            r0, r1 = ROWS[nt]
            t = t.at[r0:r1, :width].set(jnp.broadcast_to(vals[nt], (r1 - r0, width)))
        return t

    # encoder: block-diagonal weight, per-row bias
    w_enc = jnp.zeros((IN_TOTAL, HIDDEN), F32)
    w_enc = w_enc.at[:IN_CHANNELS["user"], :].set(enc["user"][0])
    w_enc = w_enc.at[IN_CHANNELS["user"]:, :].set(enc["item"][0])
    tables = [row_table({t: enc[t][1] for t in NODE_TYPES}, HIDDEN)]

    # conv layers: fused [W_l ; W_r(+W_proj)] per (layer, dst type), padded to 32 out cols
    w_conv = jnp.zeros((NUM_LAYERS * 2, 2 * HIDDEN, HIDDEN), F32)
    for layer in range(NUM_LAYERS):
        out_c = OUT if layer == NUM_LAYERS - 1 else HIDDEN
        et_p, nt_p = layers[layer]
        bias_vals, gamma_vals, beta_vals = {}, {}, {}
        for ti, t in enumerate(NODE_TYPES):
            et = next(e for e in EDGE_TYPES if e[2] == t)   # single edge type per dst here
            wl, wr, bl = et_p[et]
            proj, gamma, beta = nt_p[t]
            if proj is not None:                            # fold residual projection (linear)
                wp, bp = proj
                wr = wr + wp
                bl = bl + bp
            w_conv = w_conv.at[layer * 2 + ti, :HIDDEN, :out_c].set(wl)
            w_conv = w_conv.at[layer * 2 + ti, HIDDEN:, :out_c].set(wr)
            bias_vals[t], gamma_vals[t], beta_vals[t] = bl, gamma, beta
        tables += [row_table(bias_vals, out_c),
                   row_table(gamma_vals, out_c),
                   row_table(beta_vals, out_c)]

    # skip projections: shared across node types
    w_skip = jnp.stack([ws for ws, _ in skips])             # [NUM_LAYERS-1, HIDDEN, OUT]
    for _, bs in skips:
        tables.append(row_table({t: bs for t in NODE_TYPES}, OUT))

    tab = jnp.stack(tables)                                 # [12, 32, 32] f32
    assert tab.shape[0] == TAB_ENTRIES
    return (w_enc.astype(MXU_DTYPE), w_conv.astype(MXU_DTYPE),
            w_skip.astype(MXU_DTYPE), tab)


# ----------------------- demo / smoke test -----------------------

if __name__ == "__main__":
    key = jax.random.PRNGKey(0)
    k_params, k_xu, k_xi, k_eu, k_ev, k_fu, k_fv = jax.random.split(key, 7)

    params = init_params(k_params)

    x_user = jax.random.normal(k_xu, (NUM_NODES["user"], IN_CHANNELS["user"]), F32)
    x_item = jax.random.normal(k_xi, (NUM_NODES["item"], IN_CHANNELS["item"]), F32)

    et0, et1 = EDGE_TYPES
    edge_index_dict = {
        et0: jnp.stack([
            jax.random.randint(k_eu, (NUM_EDGES[et0],), 0, NUM_NODES["user"]),
            jax.random.randint(k_ev, (NUM_EDGES[et0],), 0, NUM_NODES["item"]),
        ]),
        et1: jnp.stack([
            jax.random.randint(k_fu, (NUM_EDGES[et1],), 0, NUM_NODES["item"]),
            jax.random.randint(k_fv, (NUM_EDGES[et1],), 0, NUM_NODES["user"]),
        ]),
    }

    # Built ONCE, outside the jitted forward.
    x_all = stack_features(x_user, x_item)
    adj_full = build_full_adj(edge_index_dict)

    out = gnn_forward_jit(x_all, adj_full, params)
    jax.block_until_ready(out)

    assert out["user"].shape == (NUM_NODES["user"], OUT)
    assert out["item"].shape == (NUM_NODES["item"], OUT)
    assert all(bool(jnp.all(jnp.isfinite(v))) for v in out.values())
    print("KERNEL_OK")
</pallas_src>

<mosaic_0001>
module attributes {stable_mosaic.version = 11 : i64} {
  func.func @_fused_gnn_kernel(%arg0: memref<32x16xbf16, #tpu.memory_space<vmem>>, %arg1: memref<32x32xbf16, #tpu.memory_space<vmem>>, %arg2: memref<16x32xbf16, #tpu.memory_space<vmem>>, %arg3: memref<6x64x32xbf16, #tpu.memory_space<vmem>>, %arg4: memref<2x32x16xbf16, #tpu.memory_space<vmem>>, %arg5: memref<12x32x32xf32, #tpu.memory_space<vmem>>, %arg6: memref<32x16xf32, #tpu.memory_space<vmem>>) attributes {dimension_semantics = [], scalar_prefetch = 0 : i64, scratch_operands = 0 : i64, tpu.core_type = #tpu.core_type<tc>} {
    %c0 = arith.constant 0 : index
    %c0_0 = arith.constant 0 : index
    %0 = vector.load %arg0[%c0, %c0_0] : memref<32x16xbf16, #tpu.memory_space<vmem>>, vector<32x16xbf16>
    %c0_1 = arith.constant 0 : index
    %c0_2 = arith.constant 0 : index
    %1 = vector.load %arg2[%c0_1, %c0_2] : memref<16x32xbf16, #tpu.memory_space<vmem>>, vector<16x32xbf16>
    %cst = arith.constant dense<0.000000e+00> : vector<32x32xf32>
    %2 = tpu.matmul %0, %1, %cst {dimension_numbers = #tpu.dot_dimension_numbers<[1], [0], [0], [1], [0, 0, 1, 1], [], []>} : vector<32x16xbf16>, vector<16x32xbf16>, vector<32x32xf32> -> vector<32x32xf32>
    %c0_3 = arith.constant 0 : index
    %c0_4 = arith.constant 0 : index
    %c0_5 = arith.constant 0 : index
    %3 = vector.load %arg5[%c0_3, %c0_4, %c0_5] : memref<12x32x32xf32, #tpu.memory_space<vmem>>, vector<1x32x32xf32>
    %4 = vector.shape_cast %3 : vector<1x32x32xf32> to vector<32x32xf32>
    %5 = arith.addf %2, %4 : vector<32x32xf32>
    %cst_6 = arith.constant 0.000000e+00 : f32
    %6 = vector.broadcast %cst_6 : f32 to vector<32x32xf32>
    %7 = arith.maximumf %5, %6 : vector<32x32xf32>
    %c0_7 = arith.constant 0 : index
    %c0_8 = arith.constant 0 : index
    %8 = vector.load %arg1[%c0_7, %c0_8] : memref<32x32xbf16, #tpu.memory_space<vmem>>, vector<32x32xbf16>
    %9 = arith.truncf %7 : vector<32x32xf32> to vector<32x32xbf16>
    %cst_9 = arith.constant dense<0.000000e+00> : vector<32x32xf32>
    %10 = tpu.matmul %8, %9, %cst_9 {dimension_numbers = #tpu.dot_dimension_numbers<[1], [0], [0], [1], [0, 0, 1, 1], [], []>} : vector<32x32xbf16>, vector<32x32xbf16>, vector<32x32xf32> -> vector<32x32xf32>
    %11 = arith.truncf %10 : vector<32x32xf32> to vector<32x32xbf16>
    %12 = vector.extract_strided_slice %11 {offsets = [0, 0], sizes = [16, 32], strides = [1, 1]} : vector<32x32xbf16> to vector<16x32xbf16>
    %13 = vector.extract_strided_slice %9 {offsets = [0, 0], sizes = [16, 32], strides = [1, 1]} : vector<32x32xbf16> to vector<16x32xbf16>
    %14 = tpu.concatenate %12, %13 in 1 : vector<16x32xbf16>, vector<16x32xbf16> -> vector<16x64xbf16>
    %c0_10 = arith.constant 0 : index
    %c0_11 = arith.constant 0 : index
    %c0_12 = arith.constant 0 : index
    %15 = vector.load %arg3[%c0_10, %c0_11, %c0_12] : memref<6x64x32xbf16, #tpu.memory_space<vmem>>, vector<1x64x32xbf16>
    %16 = vector.shape_cast %15 : vector<1x64x32xbf16> to vector<64x32xbf16>
    %cst_13 = arith.constant dense<0.000000e+00> : vector<16x32xf32>
    %17 = tpu.matmul %14, %16, %cst_13 {dimension_numbers = #tpu.dot_dimension_numbers<[1], [0], [0], [1], [0, 0, 1, 1], [], []>} : vector<16x64xbf16>, vector<64x32xbf16>, vector<16x32xf32> -> vector<16x32xf32>
    %18 = vector.extract_strided_slice %11 {offsets = [16, 0], sizes = [16, 32], strides = [1, 1]} : vector<32x32xbf16> to vector<16x32xbf16>
    %19 = vector.extract_strided_slice %9 {offsets = [16, 0], sizes = [16, 32], strides = [1, 1]} : vector<32x32xbf16> to vector<16x32xbf16>
    %20 = tpu.concatenate %18, %19 in 1 : vector<16x32xbf16>, vector<16x32xbf16> -> vector<16x64xbf16>
    %c1 = arith.constant 1 : index
    %c0_14 = arith.constant 0 : index
    %c0_15 = arith.constant 0 : index
    %21 = vector.load %arg3[%c1, %c0_14, %c0_15] : memref<6x64x32xbf16, #tpu.memory_space<vmem>>, vector<1x64x32xbf16>
    %22 = vector.shape_cast %21 : vector<1x64x32xbf16> to vector<64x32xbf16>
    %cst_16 = arith.constant dense<0.000000e+00> : vector<16x32xf32>
    %23 = tpu.matmul %20, %22, %cst_16 {dimension_numbers = #tpu.dot_dimension_numbers<[1], [0], [0], [1], [0, 0, 1, 1], [], []>} : vector<16x64xbf16>, vector<64x32xbf16>, vector<16x32xf32> -> vector<16x32xf32>
    %24 = tpu.concatenate %17, %23 in 0 : vector<16x32xf32>, vector<16x32xf32> -> vector<32x32xf32>
    %c1_17 = arith.constant 1 : index
    %c0_18 = arith.constant 0 : index
    %c0_19 = arith.constant 0 : index
    %25 = vector.load %arg5[%c1_17, %c0_18, %c0_19] : memref<12x32x32xf32, #tpu.memory_space<vmem>>, vector<1x32x32xf32>
    %26 = vector.shape_cast %25 : vector<1x32x32xf32> to vector<32x32xf32>
    %27 = arith.addf %24, %26 : vector<32x32xf32>
    %28 = arith.addf %27, %7 : vector<32x32xf32>
    %cst_20 = arith.constant 0.000000e+00 : f32
    %29 = vector.broadcast %cst_20 : f32 to vector<32x32xf32>
    %30 = arith.maximumf %28, %29 : vector<32x32xf32>
    %cst_21 = arith.constant dense<0.000000e+00> : vector<32xf32>
    %31 = vector.multi_reduction <add>, %30, %cst_21 [1] : vector<32x32xf32> to vector<32xf32>
    %32 = vector.shape_cast %31 : vector<32xf32> to vector<32x1xf32>
    %cst_22 = arith.constant 3.200000e+01 : f32
    %33 = vector.broadcast %cst_22 : f32 to vector<32x1xf32>
    %34 = arith.divf %32, %33 : vector<32x1xf32>
    %35 = vector.broadcast %34 : vector<32x1xf32> to vector<32x32xf32>
    %36 = arith.subf %30, %35 : vector<32x32xf32>
    %37 = arith.mulf %36, %36 : vector<32x32xf32>
    %cst_23 = arith.constant dense<0.000000e+00> : vector<32xf32>
    %38 = vector.multi_reduction <add>, %37, %cst_23 [1] : vector<32x32xf32> to vector<32xf32>
    %39 = vector.shape_cast %38 : vector<32xf32> to vector<32x1xf32>
    %cst_24 = arith.constant 3.200000e+01 : f32
    %40 = vector.broadcast %cst_24 : f32 to vector<32x1xf32>
    %41 = arith.divf %39, %40 : vector<32x1xf32>
    %42 = vector.broadcast %34 : vector<32x1xf32> to vector<32x32xf32>
    %43 = arith.subf %30, %42 : vector<32x32xf32>
    %cst_25 = arith.constant 9.99999974E-6 : f32
    %44 = vector.broadcast %cst_25 : f32 to vector<32x1xf32>
    %45 = arith.addf %41, %44 : vector<32x1xf32>
    %46 = math.rsqrt %45 : vector<32x1xf32>
    %47 = vector.broadcast %46 : vector<32x1xf32> to vector<32x32xf32>
    %48 = arith.mulf %43, %47 : vector<32x32xf32>
    %c2 = arith.constant 2 : index
    %c0_26 = arith.constant 0 : index
    %c0_27 = arith.constant 0 : index
    %49 = vector.load %arg5[%c2, %c0_26, %c0_27] : memref<12x32x32xf32, #tpu.memory_space<vmem>>, vector<1x32x32xf32>
    %50 = vector.shape_cast %49 : vector<1x32x32xf32> to vector<32x32xf32>
    %51 = arith.mulf %48, %50 : vector<32x32xf32>
    %c3 = arith.constant 3 : index
    %c0_28 = arith.constant 0 : index
    %c0_29 = arith.constant 0 : index
    %52 = vector.load %arg5[%c3, %c0_28, %c0_29] : memref<12x32x32xf32, #tpu.memory_space<vmem>>, vector<1x32x32xf32>
    %53 = vector.shape_cast %52 : vector<1x32x32xf32> to vector<32x32xf32>
    %54 = arith.addf %51, %53 : vector<32x32xf32>
    %55 = arith.truncf %54 : vector<32x32xf32> to vector<32x32xbf16>
    %cst_30 = arith.constant dense<0.000000e+00> : vector<32x32xf32>
    %56 = tpu.matmul %8, %55, %cst_30 {dimension_numbers = #tpu.dot_dimension_numbers<[1], [0], [0], [1], [0, 0, 1, 1], [], []>} : vector<32x32xbf16>, vector<32x32xbf16>, vector<32x32xf32> -> vector<32x32xf32>
    %57 = arith.truncf %56 : vector<32x32xf32> to vector<32x32xbf16>
    %58 = vector.extract_strided_slice %57 {offsets = [0, 0], sizes = [16, 32], strides = [1, 1]} : vector<32x32xbf16> to vector<16x32xbf16>
    %59 = vector.extract_strided_slice %55 {offsets = [0, 0], sizes = [16, 32], strides = [1, 1]} : vector<32x32xbf16> to vector<16x32xbf16>
    %60 = tpu.concatenate %58, %59 in 1 : vector<16x32xbf16>, vector<16x32xbf16> -> vector<16x64xbf16>
    %c2_31 = arith.constant 2 : index
    %c0_32 = arith.constant 0 : index
    %c0_33 = arith.constant 0 : index
    %61 = vector.load %arg3[%c2_31, %c0_32, %c0_33] : memref<6x64x32xbf16, #tpu.memory_space<vmem>>, vector<1x64x32xbf16>
    %62 = vector.shape_cast %61 : vector<1x64x32xbf16> to vector<64x32xbf16>
    %cst_34 = arith.constant dense<0.000000e+00> : vector<16x32xf32>
    %63 = tpu.matmul %60, %62, %cst_34 {dimension_numbers = #tpu.dot_dimension_numbers<[1], [0], [0], [1], [0, 0, 1, 1], [], []>} : vector<16x64xbf16>, vector<64x32xbf16>, vector<16x32xf32> -> vector<16x32xf32>
    %64 = vector.extract_strided_slice %57 {offsets = [16, 0], sizes = [16, 32], strides = [1, 1]} : vector<32x32xbf16> to vector<16x32xbf16>
    %65 = vector.extract_strided_slice %55 {offsets = [16, 0], sizes = [16, 32], strides = [1, 1]} : vector<32x32xbf16> to vector<16x32xbf16>
    %66 = tpu.concatenate %64, %65 in 1 : vector<16x32xbf16>, vector<16x32xbf16> -> vector<16x64xbf16>
    %c3_35 = arith.constant 3 : index
    %c0_36 = arith.constant 0 : index
    %c0_37 = arith.constant 0 : index
    %67 = vector.load %arg3[%c3_35, %c0_36, %c0_37] : memref<6x64x32xbf16, #tpu.memory_space<vmem>>, vector<1x64x32xbf16>
    %68 = vector.shape_cast %67 : vector<1x64x32xbf16> to vector<64x32xbf16>
    %cst_38 = arith.constant dense<0.000000e+00> : vector<16x32xf32>
    %69 = tpu.matmul %66, %68, %cst_38 {dimension_numbers = #tpu.dot_dimension_numbers<[1], [0], [0], [1], [0, 0, 1, 1], [], []>} : vector<16x64xbf16>, vector<64x32xbf16>, vector<16x32xf32> -> vector<16x32xf32>
    %70 = tpu.concatenate %63, %69 in 0 : vector<16x32xf32>, vector<16x32xf32> -> vector<32x32xf32>
    %c4 = arith.constant 4 : index
    %c0_39 = arith.constant 0 : index
    %c0_40 = arith.constant 0 : index
    %71 = vector.load %arg5[%c4, %c0_39, %c0_40] : memref<12x32x32xf32, #tpu.memory_space<vmem>>, vector<1x32x32xf32>
    %72 = vector.shape_cast %71 : vector<1x32x32xf32> to vector<32x32xf32>
    %73 = arith.addf %70, %72 : vector<32x32xf32>
    %74 = arith.addf %73, %54 : vector<32x32xf32>
    %cst_41 = arith.constant 0.000000e+00 : f32
    %75 = vector.broadcast %cst_41 : f32 to vector<32x32xf32>
    %76 = arith.maximumf %74, %75 : vector<32x32xf32>
    %cst_42 = arith.constant dense<0.000000e+00> : vector<32xf32>
    %77 = vector.multi_reduction <add>, %76, %cst_42 [1] : vector<32x32xf32> to vector<32xf32>
    %78 = vector.shape_cast %77 : vector<32xf32> to vector<32x1xf32>
    %cst_43 = arith.constant 3.200000e+01 : f32
    %79 = vector.broadcast %cst_43 : f32 to vector<32x1xf32>
    %80 = arith.divf %78, %79 : vector<32x1xf32>
    %81 = vector.broadcast %80 : vector<32x1xf32> to vector<32x32xf32>
    %82 = arith.subf %76, %81 : vector<32x32xf32>
    %83 = arith.mulf %82, %82 : vector<32x32xf32>
    %cst_44 = arith.constant dense<0.000000e+00> : vector<32xf32>
    %84 = vector.multi_reduction <add>, %83, %cst_44 [1] : vector<32x32xf32> to vector<32xf32>
    %85 = vector.shape_cast %84 : vector<32xf32> to vector<32x1xf32>
    %cst_45 = arith.constant 3.200000e+01 : f32
    %86 = vector.broadcast %cst_45 : f32 to vector<32x1xf32>
    %87 = arith.divf %85, %86 : vector<32x1xf32>
    %88 = vector.broadcast %80 : vector<32x1xf32> to vector<32x32xf32>
    %89 = arith.subf %76, %88 : vector<32x32xf32>
    %cst_46 = arith.constant 9.99999974E-6 : f32
    %90 = vector.broadcast %cst_46 : f32 to vector<32x1xf32>
    %91 = arith.addf %87, %90 : vector<32x1xf32>
    %92 = math.rsqrt %91 : vector<32x1xf32>
    %93 = vector.broadcast %92 : vector<32x1xf32> to vector<32x32xf32>
    %94 = arith.mulf %89, %93 : vector<32x32xf32>
    %c5 = arith.constant 5 : index
    %c0_47 = arith.constant 0 : index
    %c0_48 = arith.constant 0 : index
    %95 = vector.load %arg5[%c5, %c0_47, %c0_48] : memref<12x32x32xf32, #tpu.memory_space<vmem>>, vector<1x32x32xf32>
    %96 = vector.shape_cast %95 : vector<1x32x32xf32> to vector<32x32xf32>
    %97 = arith.mulf %94, %96 : vector<32x32xf32>
    %c6 = arith.constant 6 : index
    %c0_49 = arith.constant 0 : index
    %c0_50 = arith.constant 0 : index
    %98 = vector.load %arg5[%c6, %c0_49, %c0_50] : memref<12x32x32xf32, #tpu.memory_space<vmem>>, vector<1x32x32xf32>
    %99 = vector.shape_cast %98 : vector<1x32x32xf32> to vector<32x32xf32>
    %100 = arith.addf %97, %99 : vector<32x32xf32>
    %101 = arith.truncf %100 : vector<32x32xf32> to vector<32x32xbf16>
    %cst_51 = arith.constant dense<0.000000e+00> : vector<32x32xf32>
    %102 = tpu.matmul %8, %101, %cst_51 {dimension_numbers = #tpu.dot_dimension_numbers<[1], [0], [0], [1], [0, 0, 1, 1], [], []>} : vector<32x32xbf16>, vector<32x32xbf16>, vector<32x32xf32> -> vector<32x32xf32>
    %103 = arith.truncf %102 : vector<32x32xf32> to vector<32x32xbf16>
    %104 = vector.extract_strided_slice %103 {offsets = [0, 0], sizes = [16, 32], strides = [1, 1]} : vector<32x32xbf16> to vector<16x32xbf16>
    %105 = vector.extract_strided_slice %101 {offsets = [0, 0], sizes = [16, 32], strides = [1, 1]} : vector<32x32xbf16> to vector<16x32xbf16>
    %106 = tpu.concatenate %104, %105 in 1 : vector<16x32xbf16>, vector<16x32xbf16> -> vector<16x64xbf16>
    %c4_52 = arith.constant 4 : index
    %c0_53 = arith.constant 0 : index
    %c0_54 = arith.constant 0 : index
    %107 = vector.load %arg3[%c4_52, %c0_53, %c0_54] : memref<6x64x32xbf16, #tpu.memory_space<vmem>>, vector<1x64x16xbf16>
    %108 = vector.shape_cast %107 : vector<1x64x16xbf16> to vector<64x16xbf16>
    %cst_55 = arith.constant dense<0.000000e+00> : vector<16x16xf32>
    %109 = tpu.matmul %106, %108, %cst_55 {dimension_numbers = #tpu.dot_dimension_numbers<[1], [0], [0], [1], [0, 0, 1, 1], [], []>} : vector<16x64xbf16>, vector<64x16xbf16>, vector<16x16xf32> -> vector<16x16xf32>
    %110 = vector.extract_strided_slice %103 {offsets = [16, 0], sizes = [16, 32], strides = [1, 1]} : vector<32x32xbf16> to vector<16x32xbf16>
    %111 = vector.extract_strided_slice %101 {offsets = [16, 0], sizes = [16, 32], strides = [1, 1]} : vector<32x32xbf16> to vector<16x32xbf16>
    %112 = tpu.concatenate %110, %111 in 1 : vector<16x32xbf16>, vector<16x32xbf16> -> vector<16x64xbf16>
    %c5_56 = arith.constant 5 : index
    %c0_57 = arith.constant 0 : index
    %c0_58 = arith.constant 0 : index
    %113 = vector.load %arg3[%c5_56, %c0_57, %c0_58] : memref<6x64x32xbf16, #tpu.memory_space<vmem>>, vector<1x64x16xbf16>
    %114 = vector.shape_cast %113 : vector<1x64x16xbf16> to vector<64x16xbf16>
    %cst_59 = arith.constant dense<0.000000e+00> : vector<16x16xf32>
    %115 = tpu.matmul %112, %114, %cst_59 {dimension_numbers = #tpu.dot_dimension_numbers<[1], [0], [0], [1], [0, 0, 1, 1], [], []>} : vector<16x64xbf16>, vector<64x16xbf16>, vector<16x16xf32> -> vector<16x16xf32>
    %116 = tpu.concatenate %109, %115 in 0 : vector<16x16xf32>, vector<16x16xf32> -> vector<32x16xf32>
    %c7 = arith.constant 7 : index
    %c0_60 = arith.constant 0 : index
    %c0_61 = arith.constant 0 : index
    %117 = vector.load %arg5[%c7, %c0_60, %c0_61] : memref<12x32x32xf32, #tpu.memory_space<vmem>>, vector<1x32x16xf32>
    %118 = vector.shape_cast %117 : vector<1x32x16xf32> to vector<32x16xf32>
    %119 = arith.addf %116, %118 : vector<32x16xf32>
    %cst_62 = arith.constant 0.000000e+00 : f32
    %120 = vector.broadcast %cst_62 : f32 to vector<32x16xf32>
    %121 = arith.maximumf %119, %120 : vector<32x16xf32>
    %cst_63 = arith.constant dense<0.000000e+00> : vector<32xf32>
    %122 = vector.multi_reduction <add>, %121, %cst_63 [1] : vector<32x16xf32> to vector<32xf32>
    %123 = vector.shape_cast %122 : vector<32xf32> to vector<32x1xf32>
    %cst_64 = arith.constant 1.600000e+01 : f32
    %124 = vector.broadcast %cst_64 : f32 to vector<32x1xf32>
    %125 = arith.divf %123, %124 : vector<32x1xf32>
    %126 = vector.broadcast %125 : vector<32x1xf32> to vector<32x16xf32>
    %127 = arith.subf %121, %126 : vector<32x16xf32>
    %128 = arith.mulf %127, %127 : vector<32x16xf32>
    %cst_65 = arith.constant dense<0.000000e+00> : vector<32xf32>
    %129 = vector.multi_reduction <add>, %128, %cst_65 [1] : vector<32x16xf32> to vector<32xf32>
    %130 = vector.shape_cast %129 : vector<32xf32> to vector<32x1xf32>
    %cst_66 = arith.constant 1.600000e+01 : f32
    %131 = vector.broadcast %cst_66 : f32 to vector<32x1xf32>
    %132 = arith.divf %130, %131 : vector<32x1xf32>
    %133 = vector.broadcast %125 : vector<32x1xf32> to vector<32x16xf32>
    %134 = arith.subf %121, %133 : vector<32x16xf32>
    %cst_67 = arith.constant 9.99999974E-6 : f32
    %135 = vector.broadcast %cst_67 : f32 to vector<32x1xf32>
    %136 = arith.addf %132, %135 : vector<32x1xf32>
    %137 = math.rsqrt %136 : vector<32x1xf32>
    %138 = vector.broadcast %137 : vector<32x1xf32> to vector<32x16xf32>
    %139 = arith.mulf %134, %138 : vector<32x16xf32>
    %c8 = arith.constant 8 : index
    %c0_68 = arith.constant 0 : index
    %c0_69 = arith.constant 0 : index
    %140 = vector.load %arg5[%c8, %c0_68, %c0_69] : memref<12x32x32xf32, #tpu.memory_space<vmem>>, vector<1x32x16xf32>
    %141 = vector.shape_cast %140 : vector<1x32x16xf32> to vector<32x16xf32>
    %142 = arith.mulf %139, %141 : vector<32x16xf32>
    %c9 = arith.constant 9 : index
    %c0_70 = arith.constant 0 : index
    %c0_71 = arith.constant 0 : index
    %143 = vector.load %arg5[%c9, %c0_70, %c0_71] : memref<12x32x32xf32, #tpu.memory_space<vmem>>, vector<1x32x16xf32>
    %144 = vector.shape_cast %143 : vector<1x32x16xf32> to vector<32x16xf32>
    %145 = arith.addf %142, %144 : vector<32x16xf32>
    %c0_72 = arith.constant 0 : index
    %c0_73 = arith.constant 0 : index
    %c0_74 = arith.constant 0 : index
    %146 = vector.load %arg4[%c0_72, %c0_73, %c0_74] : memref<2x32x16xbf16, #tpu.memory_space<vmem>>, vector<1x32x16xbf16>
    %147 = vector.shape_cast %146 : vector<1x32x16xbf16> to vector<32x16xbf16>
    %cst_75 = arith.constant dense<0.000000e+00> : vector<32x16xf32>
    %148 = tpu.matmul %9, %147, %cst_75 {dimension_numbers = #tpu.dot_dimension_numbers<[1], [0], [0], [1], [0, 0, 1, 1], [], []>} : vector<32x32xbf16>, vector<32x16xbf16>, vector<32x16xf32> -> vector<32x16xf32>
    %149 = arith.addf %145, %148 : vector<32x16xf32>
    %c10 = arith.constant 10 : index
    %c0_76 = arith.constant 0 : index
    %c0_77 = arith.constant 0 : index
    %150 = vector.load %arg5[%c10, %c0_76, %c0_77] : memref<12x32x32xf32, #tpu.memory_space<vmem>>, vector<1x32x16xf32>
    %151 = vector.shape_cast %150 : vector<1x32x16xf32> to vector<32x16xf32>
    %152 = arith.addf %149, %151 : vector<32x16xf32>
    %c1_78 = arith.constant 1 : index
    %c0_79 = arith.constant 0 : index
    %c0_80 = arith.constant 0 : index
    %153 = vector.load %arg4[%c1_78, %c0_79, %c0_80] : memref<2x32x16xbf16, #tpu.memory_space<vmem>>, vector<1x32x16xbf16>
    %154 = vector.shape_cast %153 : vector<1x32x16xbf16> to vector<32x16xbf16>
    %cst_81 = arith.constant dense<0.000000e+00> : vector<32x16xf32>
    %155 = tpu.matmul %55, %154, %cst_81 {dimension_numbers = #tpu.dot_dimension_numbers<[1], [0], [0], [1], [0, 0, 1, 1], [], []>} : vector<32x32xbf16>, vector<32x16xbf16>, vector<32x16xf32> -> vector<32x16xf32>
    %156 = arith.addf %152, %155 : vector<32x16xf32>
    %c11 = arith.constant 11 : index
    %c0_82 = arith.constant 0 : index
    %c0_83 = arith.constant 0 : index
    %157 = vector.load %arg5[%c11, %c0_82, %c0_83] : memref<12x32x32xf32, #tpu.memory_space<vmem>>, vector<1x32x16xf32>
    %158 = vector.shape_cast %157 : vector<1x32x16xf32> to vector<32x16xf32>
    %159 = arith.addf %156, %158 : vector<32x16xf32>
    %c0_84 = arith.constant 0 : index
    %c0_85 = arith.constant 0 : index
    %160 = vector.load %arg6[%c0_84, %c0_85] : memref<32x16xf32, #tpu.memory_space<vmem>>, vector<32x16xf32>
    tpu.vector_store %arg6[%c0_84, %c0_85], %159 {strides = array<i32>} : memref<32x16xf32, #tpu.memory_space<vmem>>, vector<32x16xf32>,
    return
  }
}

</mosaic_0001>

<bundles_post_ra>
// kernel: gnn_forward.1
= control target key start
LH: loop header
LB: loop body
LE: loop exit
PB: predicated region body
PF: predicated region fallthrough
CT: control target
= control target key end

     0   :  { %11 = vsyncpa [#allocation3], 0  ;;  %s1598_s21 = smov [#allocation2]   ;;  %s1934_s0 = inlined_call_operand.vmem [shape: bf16[32,16], index: 0, kind: input, shape index: {}]   ;;  %s1935_s1 = inlined_call_operand.vmem [shape: bf16[32,32], index: 1, kind: input, shape index: {}]   ;;  %s1936_s2 = inlined_call_operand.vmem [shape: bf16[16,32], index: 2, kind: input, shape index: {}]   ;;  %s1937_s3 = inlined_call_operand.vmem [shape: bf16[6,64,32], index: 3, kind: input, shape index: {}]   ;;  %s1938_s4 = inlined_call_operand.vmem [shape: bf16[2,32,16], index: 4, kind: input, shape index: {}]   ;;  %s1939_s5 = inlined_call_operand.hbm [shape: f32[12,32,32], index: 5, kind: input, shape index: {}]   ;;  %s1940_s6 = inlined_call_operand.vmem [shape: f32[32,16], index: 6, kind: output, shape index: {}]  }
   0x1   :  { %s27_s22 = sshll.u32 %s1598_s21, 4  ;;  %s1574_s25 = scalar_lea.hbm %s1939_s5, 6144  ;;  %s28_s22 = int_to_ptr.vmem [resolvable:$true] %s27_s22 }
   0x2   :  { %p1575_p0 = scmp.ne.s32.totalorder %s1939_s5, %s1574_s25  ;;  %p1578_p1 = scmp.lt.u32.totalorder %s1574_s25, %s1939_s5 }
   0x4   :  { %p1580_p2 = pnand %p1578_p1, %p1575_p0 }
   0x6   :  { %1583 = shalt.err (!%p1580_p2)
}
   0x7   :  { %s1584_s30 = scalar_lea.vmem %s28_s22, 6144  ;;  %p1589_p4 = scmp.lt.s32.totalorder %s28_s22, %s28_s22 }
   0x8   :  { %p1585_p3 = scmp.ne.s32.totalorder %s28_s22, %s1584_s30  ;;  %p1590_p5 = scmp.lt.s32.totalorder %s1584_s30, %s1584_s30 }
   0xa   :  { %p1591_p6 = por %p1590_p5, %p1589_p4 }
   0xc   :  { %p1592_p7 = pnand %p1591_p6, %p1585_p3 }
   0xe   :  { %1595 = shalt.err (!%p1592_p7)
}
   0xf   :  { %s1599_s7 = smov 128   ;;  %s1600_s8 = smov 8  }
  0x10   :  { %33 = dma.hbm_to_vmem [thread:$0]  %s1939_s5, 6144, %s28_s22, [#allocation3], %s1599_s7, %s1599_s7, %s1600_s8  }
  0x11   :  { %1596 = dma.done.wait [#allocation3], 6144  }
  0x12   :  { %1597 = vsyncadd [#allocation3], 4294961152  ;;  %v1517_v0 = vld [vmem:[%s1936_s2] sm:$0xff]   ;;  %vm64_vm0 = vcmask 130048   ;;  %v1519_v2 = vld [vmem:[%s1934_s0 + $0x8] sm:$0xff]   ;;  %vm140_vm1 = vcmask 261120  }
  0x13   :  { %v1518_v1 = vld [vmem:[%s1934_s0] sm:$0xff]   ;;  %1381 = vmatprep.subr.bf16.mxu1 %v1517_v0  ;;  %v47_v6 = vld [vmem:[#allocation2 + $0x18] sm:$0xff]  ;;  %v46_v8 = vld [vmem:[#allocation2 + $0x10] sm:$0xff]  ;;  %v1601_v11 = vmov 0.0   ;;  %s1602_s20 = smov 32   ;;  %vm1603_vm2 = vmmov 0  }
  0x14   :  { %1382 = vmatpush3.bf16.msra.mxu1 %v1517_v0  ;;  %1383 = vmatprep.mubr.msk.bf16.mxu1 %vm64_vm0, %v1518_v1  ;;  %v1665_v3 = vld [vmem:[%s1935_s1] sm:$0xff]   ;;  %v45_v10 = vld [vmem:[#allocation2 + $0x8] sm:$0xff]  ;;  %v1526_v28 = vld [vmem:[%s1937_s3 + $0x30] sm:$0xff]   ;;  %vm236_vm3 = vcmask 523264  }
  0x15   :  { %v44_v4 = vld [vmem:[#allocation2] sm:$0xff]  ;;  %1395 = vmatprep.subr.bf16.mxu0 %v1601_v11  ;;  %v1525_v14 = vld [vmem:[%s1937_s3 + $0x8] sm:$0xff]   ;;  %v1527_v29 = vld [vmem:[%s1937_s3 + $0x10] sm:$0xff]   ;;  %1403 = vmatprep.mubr.msk.bf16.mxu0 %vm1603_vm2, %v1601_v11 }
  0x16   :  { %v1523_v7 = vld [vmem:[%s1937_s3] sm:$0xff]   ;;  %v1710_v25 = vld [vmem:[%s1935_s1 + $0x8] sm:$0xff]   ;;  %v1528_v30 = vld [vmem:[%s1937_s3 + $0x38] sm:$0xff]  }
  0x17   :  { %1384 = vmatmul.mubr.msk.bf16.vlgmr.msra.gmra.mrb[0].mxu1 %vm64_vm0, %v1519_v2  ;;  %1396 = vmatpush3.bf16.msra.mxu0 %v1523_v7  ;;  %v1522_v26 = vld [vmem:[%s1937_s3 + $0x20] sm:$0xff]   ;;  %v1524_v27 = vld [vmem:[%s1937_s3 + $0x28] sm:$0xff]   ;;  %v1529_v31 = vld [vmem:[%s1937_s3 + $0x18] sm:$0xff]  }
  0x18   :  { %1391 = vmatprep.mubr.msk.bf16.mxu1 %vm140_vm1, %v1665_v3  ;;  %1397 = vmatprep.subr.bf16.mxu0 %v1601_v11  ;;  %v365_v42 = vld [vmem:[#allocation2 + $0x30] sm:$0xff]  ;;  %v363_v43 = vld [vmem:[#allocation2 + $0x20] sm:$0xff]  ;;  %v366_v48 = vld [vmem:[#allocation2 + $0x38] sm:$0xff] }
  0x19   :  { %v364_v49 = vld [vmem:[#allocation2 + $0x28] sm:$0xff] }
  0x1b   :  { %1398 = vmatpush3.bf16.msra.mxu0 %v1525_v14 }
  0x1c   :  { %1399 = vmatprep.subr.bf16.mxu0 %v1601_v11 }
  0x1f   :  { %1400 = vmatpush3.bf16.msra.mxu0 %v1527_v29 }
  0x20   :  { %1401 = vmatprep.subr.bf16.mxu0 %v1601_v11 }
  0x23   :  { %1402 = vmatpush3.bf16.msra.mxu0 %v1529_v31 }
  0xea   :  { %v1385_v5 = vpop.f32.mrb[0].mxu1 }
  0xeb   :  { %v105_v9 = vpop.f32.mrb[1].mxu1  ;;  %v1681_v17 = vadd.f32 %v1385_v5, %v46_v8 }
  0xec   :  { %v1673_v12 = vadd.f32 %v105_v9, %v44_v4  ;;  %v1386_v13 = vpop.f32.mrb[2].mxu1 }
  0xed   :  { %v1678_v15 = vadd.f32 %v1386_v13, %v47_v6  ;;  %v108_v16 = vpop.f32.mrb[3].mxu1  ;;  %v122_v22 = vmax.f32 %v1681_v17, 0.0 }
  0xee   :  { %v1683_v18 = vadd.f32 %v108_v16, %v45_v10  ;;  %v120_v19 = vmax.f32 %v1673_v12, 0.0 }
  0xef   :  { %v123_v20 = vmax.f32 %v1678_v15, 0.0 }
  0xf0   :  { %v121_v21 = vmax.f32 %v1683_v18, 0.0 }
  0xf1   :  { %v1698_v24 = vpack.c.bf16 %v123_v20, %v122_v22 }
  0xf2   :  { %v1694_v23 = vpack.c.bf16 %v121_v21, %v120_v19 }
  0xf4   :  { %199 = vrot.lane.b32.xlu0 %v1694_v23, %s1602_s20  ;;  %1387 = vmatprep.subr.bf16.mxu1 %v1694_v23 }
  0xf5   :  { %1388 = vmatpush3.bf16.msra.mxu1 %v1694_v23 }
  0xf6   :  { %1389 = vmatprep.subr.bf16.mxu1 %v1698_v24 }
  0xf8   :  { %281 = vrot.lane.b32.xlu0 %v1698_v24, %s1602_s20 }
  0xf9   :  { %1390 = vmatpush3.bf16.msra.mxu1 %v1698_v24 }
  0xfa   :  { %1407 = vmatprep.subr.bf16.mxu1 %v1601_v11 }
  0xfc   :  { %1392 = vmatmul.mubr.msk.bf16.vlgmr.msra.gmra.mrb[4].mxu1 %vm140_vm1, %v1710_v25 }
  0xfd   :  { %1408 = vmatpush3.bf16.msra.mxu1 %v1522_v26  ;;  %1415 = vmatprep.mubr.msk.bf16.mxu1 %vm1603_vm2, %v1601_v11 }
  0xfe   :  { %1409 = vmatprep.subr.bf16.mxu1 %v1601_v11 }
 0x101   :  { %1410 = vmatpush3.bf16.msra.mxu1 %v1524_v27 }
 0x102   :  { %1411 = vmatprep.subr.bf16.mxu1 %v1601_v11 }
 0x105   :  { %1412 = vmatpush3.bf16.msra.mxu1 %v1526_v28 }
 0x106   :  { %1413 = vmatprep.subr.bf16.mxu1 %v1601_v11 }
 0x109   :  { %1414 = vmatpush3.bf16.msra.mxu1 %v1528_v30 }
 0x10a   :  { %1427 = vmatprep.subr.bf16.mxu1 %v1601_v11 }
 0x166   :  { %v200_v32 = vpop.permute.xlu0 %199 }
 0x16a   :  { %v282_v38 = vpop.permute.xlu0 %281 }
 0x1cf   :  { %v1393_v33 = vpop.f32.mrb[4].mxu1 }
 0x1d0   :  { %v181_v34 = vpop.f32.mrb[5].mxu1 }
 0x1d1   :  { %v1394_v35 = vpop.f32.mrb[6].mxu1 }
 0x1d2   :  { %v197_v36 = vpack.c.bf16 %v1394_v35, %v1393_v33  ;;  %v184_v37 = vpop.f32.mrb[7].mxu1 }
 0x1d3   :  { %v196_v39 = vpack.c.bf16 %v184_v37, %v181_v34 }
 0x1d4   :  { %v285_v40 = vsel %vm140_vm1, %v197_v36, %v282_v38 }
 0x1d5   :  { %1416 = vmatmul.mubr.msk.bf16.vlgmr.msra.gmra.mrb[8].mxu1 %vm236_vm3, %v285_v40  ;;  %v203_v41 = vsel %vm140_vm1, %v196_v39, %v200_v32 }
 0x1d6   :  { %1404 = vmatmul.mubr.msk.bf16.vlgmr.msra.gmra.mrb[0].mxu0 %vm236_vm3, %v203_v41  ;;  %1435 = vmatprep.mubr.msk.bf16.mxu1 %vm1603_vm2, %v1601_v11 }
 0x1d7   :  { %1423 = vmatprep.mubr.msk.bf16.mxu0 %vm140_vm1, %v1665_v3 }
 0x2a8   :  { %v355_v44 = vpop.f32.mrb[8].mxu1 }
 0x2a9   :  { %v369_v45 = vadd.f32 %v365_v42, %v355_v44  ;;  %v273_v46 = vpop.f32.mrb[0].mxu0  ;;  %v1417_v47 = vpop.f32.mrb[9].mxu1 }
 0x2aa   :  { %v367_v50 = vadd.f32 %v363_v43, %v273_v46  ;;  %v1405_v51 = vpop.f32.mrb[1].mxu0  ;;  %v358_v52 = vpop.f32.mrb[10].mxu1  ;;  %v433_v46 = vld [vmem:[#allocation2 + $0x40] sm:$0xff] }
 0x2ab   :  { %v373_v53 = vadd.f32 %v369_v45, %v122_v22  ;;  %v276_v54 = vpop.f32.mrb[2].mxu0  ;;  %v1418_v55 = vpop.f32.mrb[11].mxu1  ;;  %v370_v56 = vadd.f32 %v366_v48, %v358_v52  ;;  %v1531_v47 = vld [vmem:[%s1937_s3 + $0x40] sm:$0xff]  }
 0x2ac   :  { %v368_v57 = vadd.f32 %v364_v49, %v276_v54  ;;  %v1406_v58 = vpop.f32.mrb[3].mxu0  ;;  %v371_v59 = vadd.f32 %v367_v50, %v120_v19  ;;  %v434_v49 = vld [vmem:[#allocation2 + $0x48] sm:$0xff]  ;;  %1428 = vmatpush3.bf16.msra.mxu1 %v1531_v47  ;;  %v442_v54 = vld [vmem:[#allocation2 + $0x60] sm:$0xff] }
 0x2ad   :  { %v377_v60 = vmax.f32 %v373_v53, 0.0  ;;  %v374_v0 = vadd.f32 %v370_v56, %v123_v20  ;;  %v1533_v53 = vld [vmem:[%s1937_s3 + $0x48] sm:$0xff]   ;;  %v435_v56 = vld [vmem:[#allocation2 + $0x50] sm:$0xff]  ;;  %1429 = vmatprep.subr.bf16.mxu1 %v1601_v11 }
 0x2ae   :  { %v372_v61 = vadd.f32 %v368_v57, %v121_v21  ;;  %v375_v62 = vmax.f32 %v371_v59, 0.0  ;;  %v443_v55 = vld [vmem:[#allocation2 + $0x68] sm:$0xff]  ;;  %v436_v59 = vld [vmem:[#allocation2 + $0x58] sm:$0xff] }
 0x2af   :  { %v385_v63 = vsel %vm140_vm1, %v377_v60, 0.0  ;;  %v378_v5 = vmax.f32 %v374_v0, 0.0  ;;  %v444_v0 = vld [vmem:[#allocation2 + $0x70] sm:$0xff] }
 0x2b0   :  { %386 = vadd.xlane.f32.xlu0 %v385_v63  ;;  %v379_v1 = vsel %vm140_vm1, %v375_v62, 0.0  ;;  %v376_v2 = vmax.f32 %v372_v61, 0.0  ;;  %1430 = vmatpush3.bf16.msra.mxu1 %v1533_v53 }
 0x2b1   :  { %380 = vadd.xlane.f32.xlu1 %v379_v1  ;;  %v388_v6 = vsel %vm140_vm1, %v378_v5, 0.0  ;;  %v445_v1 = vld [vmem:[#allocation2 + $0x78] sm:$0xff]  ;;  %1431 = vmatprep.subr.bf16.mxu1 %v1601_v11 }
 0x2b2   :  { %v382_v4 = vsel %vm140_vm1, %v376_v2, 0.0 }
 0x2b5   :  { %383 = vadd.xlane.f32.xlu1 %v382_v4 }
 0x2b9   :  { %389 = vadd.xlane.f32.xlu1 %v388_v6 }
 0x33d   :  { %v387_v7 = vpop.xlane.xlu0 %386 }
 0x33e   :  { %v394_v8 = vmul.f32 0.03125, %v387_v7  ;;  %v381_v9 = vpop.xlane.xlu1 %380 }
 0x33f   :  { %v392_v10 = vmul.f32 0.03125, %v381_v9  ;;  %v1532_v9 = vld [vmem:[%s1937_s3 + $0x68] sm:$0xff]  }
 0x340   :  { %v398_v12 = vsub.f32 %v377_v60, %v394_v8  ;;  %v1530_v8 = vld [vmem:[%s1937_s3 + $0x60] sm:$0xff]  }
 0x341   :  { %v396_v13 = vsub.f32 %v375_v62, %v392_v10  ;;  %v1534_v10 = vld [vmem:[%s1937_s3 + $0x70] sm:$0xff]  }
 0x342   :  { %v384_v14 = vpop.xlane.xlu1 %383  ;;  %v402_v15 = vmul.f32 %v398_v12, %v398_v12 }
 0x343   :  { %v393_v16 = vmul.f32 0.03125, %v384_v14  ;;  %v400_v18 = vmul.f32 %v396_v13, %v396_v13  ;;  %v1537_v14 = vld [vmem:[%s1937_s3 + $0x58] sm:$0xff]  }
 0x344   :  { %v410_v17 = vsel %vm140_vm1, %v402_v15, 0.0 }
 0x345   :  { %v397_v19 = vsub.f32 %v376_v2, %v393_v16  ;;  %411 = vadd.xlane.f32.xlu1 %v410_v17  ;;  %v404_v22 = vsel %vm140_vm1, %v400_v18, 0.0 }
 0x346   :  { %v390_v20 = vpop.xlane.xlu1 %389 }
 0x347   :  { %v395_v21 = vmul.f32 0.03125, %v390_v20  ;;  %v401_v26 = vmul.f32 %v397_v19, %v397_v19 }
 0x349   :  { %v399_v27 = vsub.f32 %v378_v5, %v395_v21  ;;  %405 = vadd.xlane.f32.xlu1 %v404_v22  ;;  %v407_v28 = vsel %vm140_vm1, %v401_v26, 0.0 }
 0x34b   :  { %v403_v29 = vmul.f32 %v399_v27, %v399_v27 }
 0x34d   :  { %408 = vadd.xlane.f32.xlu1 %v407_v28  ;;  %v413_v30 = vsel %vm140_vm1, %v403_v29, 0.0  ;;  %v670_v28 = vld [vmem:[#allocation2 + $0x90] sm:$0xff]  ;;  %v668_v29 = vld [vmem:[#allocation2 + $0x80] sm:$0xff] }
 0x351   :  { %414 = vadd.xlane.f32.xlu1 %v413_v30 }
 0x3d2   :  { %v412_v31 = vpop.xlane.xlu1 %411 }
 0x3d3   :  { %v418_v32 = vmul.f32 0.03125, %v412_v31 }
 0x3d5   :  { %v422_v35 = vadd.f32 1e-05, %v418_v32 }
 0x3d6   :  { %v406_v33 = vpop.xlane.xlu1 %405 }
 0x3d7   :  { %v416_v34 = vmul.f32 0.03125, %v406_v33 }
 0x3d9   :  { %v420_v36 = vadd.f32 1e-05, %v416_v34  ;;  %v671_v34 = vld [vmem:[#allocation2 + $0x98] sm:$0xff] }
 0x3da   :  { %v409_v37 = vpop.xlane.xlu1 %408 }
 0x3db   :  { %1550 = vrsqrt.f32 %v420_v36  ;;  %v417_v38 = vmul.f32 0.03125, %v409_v37 }
 0x3dc   :  { %1552 = vrsqrt.f32 %v422_v35  ;;  %v669_v35 = vld [vmem:[#allocation2 + $0x88] sm:$0xff] }
 0x3dd   :  { %v421_v39 = vadd.f32 1e-05, %v417_v38 }
 0x3de   :  { %v415_v40 = vpop.xlane.xlu1 %414 }
 0x3df   :  { %1554 = vrsqrt.f32 %v421_v39  ;;  %v419_v41 = vmul.f32 0.03125, %v415_v40 }
 0x3e1   :  { %v423_v42 = vadd.f32 1e-05, %v419_v41 }
 0x3e3   :  { %1556 = vrsqrt.f32 %v423_v42 }
 0x3e5   :  { %v1551_v43 = vpop.eup %1550 }
 0x3e6   :  { %v428_v44 = vmul.f32 %v1551_v43, %v396_v13  ;;  %v1553_v45 = vpop.eup %1552  ;;  %v1536_v13 = vld [vmem:[%s1937_s3 + $0x78] sm:$0xff]  }
 0x3e7   :  { %v430_v50 = vmul.f32 %v1553_v45, %v398_v12  ;;  %v1535_v12 = vld [vmem:[%s1937_s3 + $0x50] sm:$0xff]  }
 0x3e8   :  { %v437_v52 = vmul.f32 %v433_v46, %v428_v44  ;;  %1432 = vmatpush3.bf16.msra.mxu1 %v1535_v12 }
 0x3e9   :  { %v1555_v48 = vpop.eup %1554  ;;  %v439_v63 = vmul.f32 %v435_v56, %v430_v50  ;;  %1433 = vmatprep.subr.bf16.mxu1 %v1601_v11 }
 0x3ea   :  { %v429_v51 = vmul.f32 %v1555_v48, %v397_v19  ;;  %v1772_v61 = vadd.f32 %v442_v54, %v437_v52 }
 0x3eb   :  { %v448_v5 = vadd.f32 %v444_v0, %v439_v63 }
 0x3ec   :  { %v438_v57 = vmul.f32 %v434_v49, %v429_v51  ;;  %1434 = vmatpush3.bf16.msra.mxu1 %v1537_v14 }
 0x3ed   :  { %v1557_v58 = vpop.eup %1556 }
 0x3ee   :  { %v431_v60 = vmul.f32 %v1557_v58, %v399_v27  ;;  %v1774_v62 = vadd.f32 %v443_v55, %v438_v57 }
 0x3f0   :  { %v1779_v2 = vpack.c.bf16 %v1774_v62, %v1772_v61  ;;  %v440_v4 = vmul.f32 %v436_v59, %v431_v60 }
 0x3f2   :  { %504 = vrot.lane.b32.xlu1 %v1779_v2, %s1602_s20  ;;  %1419 = vmatprep.subr.bf16.mxu0 %v1779_v2  ;;  %v449_v6 = vadd.f32 %v445_v1, %v440_v4 }
 0x3f3   :  { %1420 = vmatpush3.bf16.msra.mxu0 %v1779_v2 }
 0x3f4   :  { %v1785_v7 = vpack.c.bf16 %v449_v6, %v448_v5 }
 0x3f6   :  { %586 = vrot.lane.b32.xlu0 %v1785_v7, %s1602_s20  ;;  %1421 = vmatprep.subr.bf16.mxu0 %v1785_v7 }
 0x3f7   :  { %1422 = vmatpush3.bf16.msra.mxu0 %v1785_v7 }
 0x3f8   :  { %1439 = vmatprep.subr.bf16.mxu0 %v1601_v11 }
 0x3fa   :  { %1424 = vmatmul.mubr.msk.bf16.vlgmr.msra.gmra.mrb[4].mxu0 %vm140_vm1, %v1710_v25 }
 0x3fb   :  { %1440 = vmatpush3.bf16.msra.mxu0 %v1530_v8  ;;  %1447 = vmatprep.mubr.msk.bf16.mxu0 %vm1603_vm2, %v1601_v11 }
 0x3fc   :  { %1441 = vmatprep.subr.bf16.mxu0 %v1601_v11 }
 0x3ff   :  { %1442 = vmatpush3.bf16.msra.mxu0 %v1532_v9 }
 0x400   :  { %1443 = vmatprep.subr.bf16.mxu0 %v1601_v11 }
 0x403   :  { %1444 = vmatpush3.bf16.msra.mxu0 %v1534_v10 }
 0x404   :  { %1445 = vmatprep.subr.bf16.mxu0 %v1601_v11 }
 0x407   :  { %1446 = vmatpush3.bf16.msra.mxu0 %v1536_v13 }
 0x408   :  { %1459 = vmatprep.subr.bf16.mxu0 %v1601_v11 }
 0x464   :  { %v505_v22 = vpop.permute.xlu1 %504 }
 0x468   :  { %v587_v20 = vpop.permute.xlu0 %586 }
 0x4cd   :  { %v1425_v15 = vpop.f32.mrb[4].mxu0 }
 0x4ce   :  { %v486_v16 = vpop.f32.mrb[5].mxu0 }
 0x4cf   :  { %v1426_v17 = vpop.f32.mrb[6].mxu0 }
 0x4d0   :  { %v502_v18 = vpack.c.bf16 %v1426_v17, %v1425_v15  ;;  %v489_v19 = vpop.f32.mrb[7].mxu0 }
 0x4d1   :  { %v501_v21 = vpack.c.bf16 %v489_v19, %v486_v16 }
 0x4d2   :  { %v590_v26 = vsel %vm140_vm1, %v502_v18, %v587_v20 }
 0x4d3   :  { %v508_v27 = vsel %vm140_vm1, %v501_v21, %v505_v22  ;;  %1448 = vmatmul.mubr.msk.bf16.vlgmr.msra.gmra.mrb[8].mxu0 %vm236_vm3, %v590_v26 }
 0x4d4   :  { %1436 = vmatmul.mubr.msk.bf16.vlgmr.msra.gmra.mrb[12].mxu1 %vm236_vm3, %v508_v27  ;;  %1467 = vmatprep.mubr.msk.bf16.mxu0 %vm1603_vm2, %v1601_v11 }
 0x4d5   :  { %1455 = vmatprep.mubr.msk.bf16.mxu1 %vm140_vm1, %v1665_v3 }
 0x5a6   :  { %v660_v30 = vpop.f32.mrb[8].mxu0 }
 0x5a7   :  { %v674_v31 = vadd.f32 %v670_v28, %v660_v30  ;;  %v578_v32 = vpop.f32.mrb[12].mxu1  ;;  %v1449_v33 = vpop.f32.mrb[9].mxu0 }
 0x5a8   :  { %v672_v36 = vadd.f32 %v668_v29, %v578_v32  ;;  %v1437_v37 = vpop.f32.mrb[13].mxu1  ;;  %v663_v38 = vpop.f32.mrb[10].mxu0 }
 0x5a9   :  { %v581_v39 = vpop.f32.mrb[14].mxu1  ;;  %v1450_v40 = vpop.f32.mrb[11].mxu0  ;;  %v678_v41 = vadd.f32 %v674_v31, %v448_v5  ;;  %v675_v43 = vadd.f32 %v671_v34, %v663_v38  ;;  %v737_v31 = vld [vmem:[#allocation2 + $0xa0] sm:$0xff]  ;;  %v738_v34 = vld [vmem:[#allocation2 + $0xa8] sm:$0xff] }
 0x5aa   :  { %v676_v42 = vadd.f32 %v672_v36, %v1772_v61  ;;  %v673_v44 = vadd.f32 %v669_v35, %v581_v39  ;;  %v1438_v45 = vpop.f32.mrb[15].mxu1  ;;  %v1539_v37 = vld [vmem:[%s1937_s3 + $0x80] sm:$0xff]   ;;  %v747_v40 = vld [vmem:[#allocation2 + $0xc8] sm:$0xff] }
 0x5ab   :  { %v679_v47 = vadd.f32 %v675_v43, %v449_v6  ;;  %v682_v50 = vmax.f32 %v678_v41, 0.0  ;;  %v746_v39 = vld [vmem:[#allocation2 + $0xc0] sm:$0xff]  ;;  %1460 = vmatpush3.bf16.msra.mxu0 %v1539_v37  ;;  %v1541_v43 = vld [vmem:[%s1937_s3 + $0x88] sm:$0xff]  }
 0x5ac   :  { %v677_v3 = vadd.f32 %v673_v44, %v1774_v62  ;;  %v680_v46 = vmax.f32 %v676_v42, 0.0  ;;  %v739_v44 = vld [vmem:[#allocation2 + $0xb0] sm:$0xff]  ;;  %1461 = vmatprep.subr.bf16.mxu0 %v1601_v11 }
 0x5ad   :  { %v690_v52 = vsel %vm140_vm1, %v682_v50, 0.0  ;;  %v683_v53 = vmax.f32 %v679_v47, 0.0  ;;  %v740_v47 = vld [vmem:[#allocation2 + $0xb8] sm:$0xff] }
 0x5ae   :  { %v684_v48 = vsel %vm140_vm1, %v680_v46, 0.0  ;;  %v681_v49 = vmax.f32 %v677_v3, 0.0 }
 0x5af   :  { %685 = vadd.xlane.f32.xlu1 %v684_v48  ;;  %v693_v54 = vsel %vm140_vm1, %v683_v53, 0.0  ;;  %1462 = vmatpush3.bf16.msra.mxu0 %v1541_v43 }
 0x5b0   :  { %v687_v51 = vsel %vm140_vm1, %v681_v49, 0.0  ;;  %1463 = vmatprep.subr.bf16.mxu0 %v1601_v11 }
 0x5b1   :  { %688 = vadd.xlane.f32.xlu0 %v687_v51  ;;  %v748_v51 = vld [vmem:[#allocation2 + $0xd0] sm:$0xff] }
 0x5b3   :  { %691 = vadd.xlane.f32.xlu1 %v690_v52  ;;  %v749_v52 = vld [vmem:[#allocation2 + $0xd8] sm:$0xff] }
 0x5b7   :  { %694 = vadd.xlane.f32.xlu1 %v693_v54 }
 0x63c   :  { %v686_v55 = vpop.xlane.xlu1 %685 }
 0x63d   :  { %v696_v56 = vmul.f32 0.03125, %v686_v55 }
 0x63e   :  { %v689_v57 = vpop.xlane.xlu0 %688 }
 0x63f   :  { %v700_v58 = vsub.f32 %v680_v46, %v696_v56  ;;  %v697_v59 = vmul.f32 0.03125, %v689_v57  ;;  %v1538_v57 = vld [vmem:[%s1937_s3 + $0xa0] sm:$0xff]  }
 0x640   :  { %v692_v60 = vpop.xlane.xlu1 %691 }
 0x641   :  { %v701_v61 = vsub.f32 %v681_v49, %v697_v59  ;;  %v698_v62 = vmul.f32 0.03125, %v692_v60  ;;  %v704_v63 = vmul.f32 %v700_v58, %v700_v58  ;;  %v1542_v59 = vld [vmem:[%s1937_s3 + $0xb0] sm:$0xff]   ;;  %v1544_v60 = vld [vmem:[%s1937_s3 + $0xb8] sm:$0xff]  }
 0x643   :  { %v702_v0 = vsub.f32 %v682_v50, %v698_v62  ;;  %v708_v1 = vsel %vm140_vm1, %v704_v63, 0.0  ;;  %v705_v4 = vmul.f32 %v701_v61, %v701_v61  ;;  %v1546_v62 = vld [vmem:[%s1938_s4] sm:$0xff]  }
 0x644   :  { %709 = vadd.xlane.f32.xlu1 %v708_v1  ;;  %v695_v5 = vpop.xlane.xlu1 %694 }
 0x645   :  { %v699_v6 = vmul.f32 0.03125, %v695_v5  ;;  %v711_v8 = vsel %vm140_vm1, %v705_v4, 0.0  ;;  %v706_v9 = vmul.f32 %v702_v0, %v702_v0 }
 0x646   :  { %712 = vadd.xlane.f32.xlu0 %v711_v8 }
 0x647   :  { %v703_v10 = vsub.f32 %v683_v53, %v699_v6  ;;  %v714_v12 = vsel %vm140_vm1, %v706_v9, 0.0 }
 0x648   :  { %715 = vadd.xlane.f32.xlu1 %v714_v12 }
 0x649   :  { %v707_v13 = vmul.f32 %v703_v10, %v703_v10 }
 0x64b   :  { %v717_v14 = vsel %vm140_vm1, %v707_v13, 0.0  ;;  %v1548_v13 = vld [vmem:[%s1938_s4 + $0x10] sm:$0xff]  }
 0x64c   :  { %718 = vadd.xlane.f32.xlu0 %v717_v14  ;;  %v1549_v14 = vld [vmem:[%s1938_s4 + $0x18] sm:$0xff]  }
 0x6d1   :  { %v710_v15 = vpop.xlane.xlu1 %709 }
 0x6d2   :  { %v720_v16 = vmul.f32 0.03125, %v710_v15  ;;  %v972_v15 = vld [vmem:[#allocation2 + $0xe0] sm:$0xff] }
 0x6d3   :  { %v713_v17 = vpop.xlane.xlu0 %712 }
 0x6d4   :  { %v724_v18 = vadd.f32 1e-05, %v720_v16  ;;  %v721_v19 = vmul.f32 0.03125, %v713_v17 }
 0x6d5   :  { %v716_v20 = vpop.xlane.xlu1 %715 }
 0x6d6   :  { %1558 = vrsqrt.f32 %v724_v18  ;;  %v725_v21 = vadd.f32 1e-05, %v721_v19  ;;  %v722_v22 = vmul.f32 0.03125, %v716_v20  ;;  %v975_v19 = vld [vmem:[#allocation2 + $0xf8] sm:$0xff]  ;;  %v973_v20 = vld [vmem:[#allocation2 + $0xe8] sm:$0xff] }
 0x6d8   :  { %1560 = vrsqrt.f32 %v725_v21  ;;  %v726_v26 = vadd.f32 1e-05, %v722_v22 }
 0x6d9   :  { %v719_v27 = vpop.xlane.xlu0 %718 }
 0x6da   :  { %1562 = vrsqrt.f32 %v726_v26  ;;  %v723_v28 = vmul.f32 0.03125, %v719_v27 }
 0x6dc   :  { %v727_v29 = vadd.f32 1e-05, %v723_v28 }
 0x6de   :  { %1564 = vrsqrt.f32 %v727_v29 }
 0x6e0   :  { %v1559_v30 = vpop.eup %1558 }
 0x6e1   :  { %v732_v32 = vmul.f32 %v1559_v30, %v700_v58  ;;  %v1540_v58 = vld [vmem:[%s1937_s3 + $0xa8] sm:$0xff]  }
 0x6e2   :  { %v1561_v33 = vpop.eup %1560 }
 0x6e3   :  { %v733_v35 = vmul.f32 %v1561_v33, %v701_v61  ;;  %v741_v36 = vmul.f32 %v737_v31, %v732_v32  ;;  %v1545_v61 = vld [vmem:[%s1937_s3 + $0x98] sm:$0xff]  }
 0x6e4   :  { %v1563_v38 = vpop.eup %1562 }
 0x6e5   :  { %v742_v41 = vmul.f32 %v738_v34, %v733_v35  ;;  %v734_v42 = vmul.f32 %v1563_v38, %v702_v0  ;;  %v750_v45 = vadd.f32 %v746_v39, %v741_v36 }
 0x6e7   :  { %v751_v3 = vadd.f32 %v747_v40, %v742_v41  ;;  %v743_v50 = vmul.f32 %v739_v44, %v734_v42 }
 0x6e8   :  { %v1565_v46 = vpop.eup %1564 }
 0x6e9   :  { %v754_v48 = vpack.c.bf16 %v751_v3, %v750_v45  ;;  %v735_v49 = vmul.f32 %v1565_v46, %v703_v10  ;;  %v752_v54 = vadd.f32 %v748_v51, %v743_v50  ;;  %v1547_v10 = vld [vmem:[%s1938_s4 + $0x8] sm:$0xff]  }
 0x6eb   :  { %808 = vrot.lane.b32.xlu1 %v754_v48, %s1602_s20  ;;  %1451 = vmatprep.subr.bf16.mxu1 %v754_v48  ;;  %v744_v53 = vmul.f32 %v740_v47, %v735_v49 }
 0x6ec   :  { %1452 = vmatpush3.bf16.msra.mxu1 %v754_v48 }
 0x6ed   :  { %v753_v55 = vadd.f32 %v749_v52, %v744_v53 }
 0x6ef   :  { %v755_v56 = vpack.c.bf16 %v753_v55, %v752_v54 }
 0x6f1   :  { %890 = vrot.lane.b32.xlu0 %v755_v56, %s1602_s20  ;;  %1453 = vmatprep.subr.bf16.mxu1 %v755_v56 }
 0x6f2   :  { %1454 = vmatpush3.bf16.msra.mxu1 %v755_v56 }
 0x6f3   :  { %1471 = vmatprep.subr.bf16.mxu1 %v1601_v11 }
 0x6f5   :  { %1456 = vmatmul.mubr.msk.bf16.vlgmr.msra.gmra.mrb[16].mxu1 %vm140_vm1, %v1710_v25  ;;  %v1543_v25 = vld [vmem:[%s1937_s3 + $0x90] sm:$0xff]  }
 0x6f6   :  { %1472 = vmatpush3.bf16.msra.mxu1 %v1538_v57  ;;  %1479 = vmatprep.mubr.msk.bf16.mxu1 %vm1603_vm2, %v1601_v11 }
 0x6f7   :  { %1473 = vmatprep.subr.bf16.mxu1 %v1601_v11  ;;  %1464 = vmatpush3.bf16.msra.mxu0 %v1543_v25 }
 0x6f8   :  { %1465 = vmatprep.subr.bf16.mxu0 %v1601_v11 }
 0x6fa   :  { %1474 = vmatpush3.bf16.msra.mxu1 %v1540_v58 }
 0x6fb   :  { %1475 = vmatprep.subr.bf16.mxu1 %v1601_v11  ;;  %1466 = vmatpush3.bf16.msra.mxu0 %v1545_v61 }
 0x6fc   :  { %1483 = vmatprep.subr.bf16.mxu0 %v1546_v62 }
 0x6fe   :  { %1476 = vmatpush3.bf16.msra.mxu1 %v1542_v59 }
 0x6ff   :  { %1477 = vmatprep.subr.bf16.mxu1 %v1601_v11 }
 0x702   :  { %1478 = vmatpush3.bf16.msra.mxu1 %v1544_v60 }
 0x75d   :  { %v809_v8 = vpop.permute.xlu1 %808 }
 0x763   :  { %v891_v5 = vpop.permute.xlu0 %890 }
 0x7c8   :  { %v1457_v63 = vpop.f32.mrb[16].mxu1 }
 0x7c9   :  { %v790_v0 = vpop.f32.mrb[17].mxu1 }
 0x7ca   :  { %v1458_v1 = vpop.f32.mrb[18].mxu1 }
 0x7cb   :  { %v806_v4 = vpack.c.bf16 %v1458_v1, %v1457_v63  ;;  %v793_v11 = vpop.f32.mrb[19].mxu1 }
 0x7cc   :  { %v805_v6 = vpack.c.bf16 %v793_v11, %v790_v0 }
 0x7cd   :  { %v894_v9 = vsel %vm140_vm1, %v806_v4, %v891_v5 }
 0x7ce   :  { %v812_v12 = vsel %vm140_vm1, %v805_v6, %v809_v8  ;;  %1480 = vmatmul.mubr.msk.bf16.vlgmr.msra.gmra.mrb[20].mxu1 %vm236_vm3, %v894_v9 }
 0x7cf   :  { %1468 = vmatmul.mubr.msk.bf16.vlgmr.msra.gmra.mrb[12].mxu0 %vm236_vm3, %v812_v12  ;;  %v1038_v12 = vld [vmem:[#allocation2 + $0x100] sm:$0xff] }
 0x7d0   :  { %1484 = vmatpush3.bf16.msra.mxu0 %v1546_v62  ;;  %1487 = vmatprep.mubr.msk.bf16.mxu0 %vm140_vm1, %v1694_v23  ;;  %v974_v23 = vld [vmem:[#allocation2 + $0xf0] sm:$0xff] }
 0x7d1   :  { %1485 = vmatprep.subr.bf16.mxu0 %v1547_v10 }
 0x7d4   :  { %1486 = vmatpush3.bf16.msra.mxu0 %v1547_v10 }
 0x7d5   :  { %1491 = vmatprep.subr.bf16.mxu0 %v1548_v13 }
 0x7d7   :  { %1488 = vmatmul.mubr.msk.bf16.vlgmr.msra.gmra.mrb[16].mxu0 %vm140_vm1, %v1698_v24 }
 0x7d8   :  { %1495 = vmatprep.mubr.msk.bf16.mxu0 %vm140_vm1, %v1779_v2  ;;  %1492 = vmatpush3.bf16.msra.mxu0 %v1548_v13 }
 0x7d9   :  { %1493 = vmatprep.subr.bf16.mxu0 %v1549_v14 }
 0x7dc   :  { %1494 = vmatpush3.bf16.msra.mxu0 %v1549_v14 }
 0x7e3   :  { %1496 = vmatmul.mubr.msk.bf16.vlgmr.msra.gmra.mrb[16].mxu0 %vm140_vm1, %v1785_v7 }
 0x8a1   :  { %v964_v16 = vpop.f32.mrb[20].mxu1 }
 0x8a2   :  { %v882_v17 = vpop.f32.mrb[12].mxu0  ;;  %v1481_v18 = vpop.f32.mrb[21].mxu1  ;;  %v978_v21 = vadd.f32 %v974_v23, %v964_v16  ;;  %v1047_v23 = vld [vmem:[#allocation2 + $0x120] sm:$0xff] }
 0x8a3   :  { %v976_v22 = vadd.f32 %v972_v15, %v882_v17  ;;  %v1469_v26 = vpop.f32.mrb[13].mxu0  ;;  %v967_v24 = vpop.f32.mrb[22].mxu1  ;;  %v1039_v15 = vld [vmem:[#allocation2 + $0x108] sm:$0xff] }
 0x8a4   :  { %v885_v27 = vpop.f32.mrb[14].mxu0  ;;  %v1482_v28 = vpop.f32.mrb[23].mxu1  ;;  %v979_v29 = vadd.f32 %v975_v19, %v967_v24  ;;  %v982_v32 = vmax.f32 %v978_v21, 0.0  ;;  %v1131_v19 = vld [vmem:[#allocation2 + $0x140] sm:$0xff]  ;;  %v1040_v21 = vld [vmem:[#allocation2 + $0x110] sm:$0xff] }
 0x8a5   :  { %v980_v2 = vmax.f32 %v976_v22, 0.0  ;;  %v977_v30 = vadd.f32 %v973_v20, %v885_v27  ;;  %v1470_v31 = vpop.f32.mrb[15].mxu0  ;;  %v1048_v20 = vld [vmem:[#allocation2 + $0x128] sm:$0xff] }
 0x8a6   :  { %v983_v34 = vmax.f32 %v979_v29, 0.0  ;;  %v990_v36 = vsel %vm64_vm0, %v982_v32, 0.0  ;;  %v1132_v28 = vld [vmem:[#allocation2 + $0x148] sm:$0xff]  ;;  %v1041_v29 = vld [vmem:[#allocation2 + $0x118] sm:$0xff] }
 0x8a7   :  { %v981_v33 = vmax.f32 %v977_v30, 0.0  ;;  %v984_v7 = vsel %vm64_vm0, %v980_v2, 0.0 }
 0x8a8   :  { %985 = vadd.xlane.f32.xlu1 %v984_v7  ;;  %v993_v37 = vsel %vm64_vm0, %v983_v34, 0.0  ;;  %v1216_v7 = vld [vmem:[#allocation2 + $0x160] sm:$0xff] }
 0x8a9   :  { %v987_v35 = vsel %vm64_vm0, %v981_v33, 0.0 }
 0x8aa   :  { %988 = vadd.xlane.f32.xlu0 %v987_v35  ;;  %v1050_v35 = vld [vmem:[#allocation2 + $0x138] sm:$0xff] }
 0x8ac   :  { %991 = vadd.xlane.f32.xlu1 %v990_v36 }
 0x8ae   :  { %994 = vadd.xlane.f32.xlu0 %v993_v37 }
 0x8b6   :  { %v1902_v38 = vpop.f32.mrb[16].mxu0 }
 0x8b7   :  { %v1904_v39 = vpop.f32.mrb[17].mxu0 }
 0x8b8   :  { %v1906_v40 = vpop.f32.mrb[18].mxu0 }
 0x8b9   :  { %v1908_v41 = vpop.f32.mrb[19].mxu0 }
 0x935   :  { %v986_v42 = vpop.xlane.xlu1 %985 }
 0x936   :  { %v997_v43 = vmul.f32 0.0625, %v986_v42 }
 0x937   :  { %v989_v44 = vpop.xlane.xlu0 %988 }
 0x938   :  { %v1001_v45 = vsub.f32 %v980_v2, %v997_v43  ;;  %v998_v3 = vmul.f32 0.0625, %v989_v44  ;;  %v1049_v2 = vld [vmem:[#allocation2 + $0x130] sm:$0xff]  ;;  %v1217_v44 = vld [vmem:[#allocation2 + $0x168] sm:$0xff] }
 0x939   :  { %v992_v46 = vpop.xlane.xlu1 %991 }
 0x93a   :  { %v1002_v47 = vsub.f32 %v981_v33, %v998_v3  ;;  %v999_v48 = vmul.f32 0.0625, %v992_v46  ;;  %v1005_v49 = vmul.f32 %v1001_v45, %v1001_v45 }
 0x93b   :  { %v995_v50 = vpop.xlane.xlu0 %994 }
 0x93c   :  { %v1003_v51 = vsub.f32 %v982_v32, %v999_v48  ;;  %v1000_v52 = vmul.f32 0.0625, %v995_v50  ;;  %v1009_v53 = vsel %vm64_vm0, %v1005_v49, 0.0  ;;  %v1006_v54 = vmul.f32 %v1002_v47, %v1002_v47  ;;  %v1218_v49 = vld [vmem:[#allocation2 + $0x170] sm:$0xff] }
 0x93d   :  { %1010 = vadd.xlane.f32.xlu1 %v1009_v53 }
 0x93e   :  { %v1004_v55 = vsub.f32 %v983_v34, %v1000_v52  ;;  %v1012_v56 = vsel %vm64_vm0, %v1006_v54, 0.0  ;;  %v1007_v57 = vmul.f32 %v1003_v51, %v1003_v51  ;;  %v1133_v34 = vld [vmem:[#allocation2 + $0x150] sm:$0xff]  ;;  %v1219_v52 = vld [vmem:[#allocation2 + $0x178] sm:$0xff] }
 0x93f   :  { %1013 = vadd.xlane.f32.xlu0 %v1012_v56 }
 0x940   :  { %v1015_v58 = vsel %vm64_vm0, %v1007_v57, 0.0  ;;  %v1008_v59 = vmul.f32 %v1004_v55, %v1004_v55 }
 0x941   :  { %1016 = vadd.xlane.f32.xlu1 %v1015_v58 }
 0x942   :  { %v1018_v25 = vsel %vm64_vm0, %v1008_v59, 0.0 }
 0x943   :  { %1019 = vadd.xlane.f32.xlu0 %v1018_v25 }
 0x9ca   :  { %v1011_v60 = vpop.xlane.xlu1 %1010 }
 0x9cb   :  { %v1021_v61 = vmul.f32 0.0625, %v1011_v60 }
 0x9cc   :  { %v1014_v62 = vpop.xlane.xlu0 %1013 }
 0x9cd   :  { %v1025_v63 = vadd.f32 1e-05, %v1021_v61  ;;  %v1022_v0 = vmul.f32 0.0625, %v1014_v62 }
 0x9ce   :  { %v1017_v1 = vpop.xlane.xlu1 %1016 }
 0x9cf   :  { %1566 = vrsqrt.f32 %v1025_v63  ;;  %v1026_v4 = vadd.f32 1e-05, %v1022_v0  ;;  %v1023_v11 = vmul.f32 0.0625, %v1017_v1 }
 0x9d0   :  { %v1020_v5 = vpop.xlane.xlu0 %1019 }
 0x9d1   :  { %1568 = vrsqrt.f32 %v1026_v4  ;;  %v1027_v6 = vadd.f32 1e-05, %v1023_v11  ;;  %v1024_v8 = vmul.f32 0.0625, %v1020_v5 }
 0x9d3   :  { %1570 = vrsqrt.f32 %v1027_v6  ;;  %v1028_v9 = vadd.f32 1e-05, %v1024_v8 }
 0x9d5   :  { %1572 = vrsqrt.f32 %v1028_v9 }
 0x9d9   :  { %v1567_v10 = vpop.eup %1566 }
 0x9da   :  { %v1033_v13 = vmul.f32 %v1567_v10, %v1001_v45  ;;  %v1134_v45 = vld [vmem:[#allocation2 + $0x158] sm:$0xff] }
 0x9db   :  { %v1569_v14 = vpop.eup %1568 }
 0x9dc   :  { %v1042_v16 = vmul.f32 %v1038_v12, %v1033_v13  ;;  %v1034_v17 = vmul.f32 %v1569_v14, %v1002_v47 }
 0x9dd   :  { %v1571_v18 = vpop.eup %1570 }
 0x9de   :  { %v1051_v22 = vadd.f32 %v1047_v23, %v1042_v16  ;;  %v1043_v26 = vmul.f32 %v1039_v15, %v1034_v17  ;;  %v1035_v24 = vmul.f32 %v1571_v18, %v1003_v51 }
 0x9df   :  { %v1573_v27 = vpop.eup %1572 }
 0x9e0   :  { %v1501_v30 = vadd.f32 %v1131_v19, %v1051_v22  ;;  %v1052_v31 = vadd.f32 %v1048_v20, %v1043_v26  ;;  %v1044_v32 = vmul.f32 %v1040_v21, %v1035_v24  ;;  %v1036_v33 = vmul.f32 %v1573_v27, %v1004_v55 }
 0x9e2   :  { %v1502_v36 = vadd.f32 %v1501_v30, %v1904_v39  ;;  %v1505_v37 = vadd.f32 %v1132_v28, %v1052_v31  ;;  %v1053_v42 = vadd.f32 %v1049_v2, %v1044_v32  ;;  %v1045_v43 = vmul.f32 %v1041_v29, %v1036_v33 }
 0x9e4   :  { %v1220_v3 = vadd.f32 %v1502_v36, %v1216_v7  ;;  %v1506_v46 = vadd.f32 %v1505_v37, %v1908_v41  ;;  %v1499_v47 = vadd.f32 %v1133_v34, %v1053_v42  ;;  %v1054_v48 = vadd.f32 %v1050_v35, %v1045_v43 }
 0x9e6   :  { %1224 = vst.msk [vmem:[%s1940_s6] sm:$0xff] %vm64_vm0, %v1220_v3  ;;  %v1221_v50 = vadd.f32 %v1506_v46, %v1217_v44  ;;  %v1500_v51 = vadd.f32 %v1499_v47, %v1902_v38  ;;  %v1503_v39 = vadd.f32 %v1134_v45, %v1054_v48 }
 0x9e8   :  { %1225 = vst.msk [vmem:[%s1940_s6 + $0x8] sm:$0xff] %vm64_vm0, %v1221_v50  ;;  %v1222_v53 = vadd.f32 %v1500_v51, %v1218_v49  ;;  %v1504_v41 = vadd.f32 %v1503_v39, %v1906_v40 }
 0x9ea   :  { %1226 = vst.msk [vmem:[%s1940_s6 + $0x10] sm:$0xff] %vm64_vm0, %v1222_v53  ;;  %v1223_v54 = vadd.f32 %v1504_v41, %v1219_v52 }
 0x9ec   :  { %1227 = vst.msk [vmem:[%s1940_s6 + $0x18] sm:$0xff] %vm64_vm0, %v1223_v54 }
 0x9ed   :  { %1232 = vsyncpa [#allocation3], 1 }

</bundles_post_ra>
